<compile_context>
chip_gen: v7x
topology: tpu7x:2x2x1
jax: 0.10.0
libtpu: 0.0.40
codegen_flags: <defaults>
</compile_context>

<pallas_src>
import functools

import jax
import jax.numpy as jnp
from jax.experimental import pallas as pl
from jax.experimental.pallas import tpu as pltpu


def _cdiv(a, b):
    return -(-a // b)


def _round_up(x, m):
    return _cdiv(x, m) * m


def _pick_tile_n(hw, c_new, c_old, itemsize, has_mask, *,
                 budget_bytes=8 << 20, max_tile_n=16384):
    """Pick a lane-tile so the per-step working set stays in a few MiB."""
    per_lane = 2 * (c_new + c_old) * itemsize          # double-buffered input blocks
    per_lane += (2 * c_new + 3 * c_old + 12) * 4       # f32 intermediates (e, w, w*x, rows)
    per_lane += (8 if has_mask else 0) + 8 + 4         # mask / out blocks + accumulator
    tile = budget_bytes // per_lane
    tile = min(tile, max_tile_n, _round_up(hw, 128))
    tile = max(128, (tile // 128) * 128)
    return int(tile)


def _per_pixel_loss(x, t, *, c_old, alpha, approx_div):
    """x: (C_new, N) f32 new-model logits, t: (C_old, N) f32 old-model logits.

    Returns the (1, N) per-pixel unbiased-KD loss (un-negated, un-reduced)."""
    if alpha != 1.0:
        t = t * jnp.float32(alpha)

    # Shared numerically-stable logsumexp pieces over the channel axis.
    m = jnp.max(x, axis=0, keepdims=True)                 # (1, N)
    e = jnp.exp(x - m)                                    # (C_new, N)   EUP
    s_all = jnp.sum(e, axis=0, keepdims=True)             # (1, N)
    log_s_all = jnp.log(s_all)
    den = m + log_s_all                                   # logsumexp(x, axis=0)

    # Background sum over channels {0} U [c_old, C_new), reused algebraically:
    #   s_bkg = s_all - sum(e[1:c_old]) = s_all - (sum(e[:c_old]) - e[0])
    # (row-0-aligned slices only; no iota masks, no second max/exp pass)
    s_fg = jnp.sum(e[0:c_old], axis=0, keepdims=True) - e[0:1]
    # Guard underflow / cancellation (reference would give -inf/NaN there).
    s_bkg = jnp.maximum(s_all - s_fg, jnp.float32(1e-37))
    out_bkg = jnp.log(s_bkg) - log_s_all                  # == logsumexp(x[bkg]) - den

    # Un-normalized teacher softmax weights.
    tm = jnp.max(t, axis=0, keepdims=True)
    w = jnp.exp(t - tm)                                   # (C_old, N)
    w_sum = jnp.sum(w, axis=0, keepdims=True)             # (1, N)
    w0 = w[0:1]

    # fg = sum_{c=1..c_old-1} w[c]*x[c] = sum(w*x[:c_old]) - w[0]*x[0]
    wx = w * x[0:c_old]
    fg = jnp.sum(wx, axis=0, keepdims=True) - wx[0:1]     # (1, N)

    # loss = (labels[0]*out_bkg + sum_{c>=1} labels[c]*(x[c]-den)) / c_old
    num = w0 * out_bkg + fg - (w_sum - w0) * den
    denom = w_sum * jnp.float32(c_old)
    if approx_div:
        return num * pl.reciprocal(denom, approx=True)    # EUP slot (has slack)
    return num / denom


def _ukd_map_kernel(x_ref, t_ref, *rest, c_old, alpha, has_mask):
    # x_ref: (1, C_new, TILE_N), t_ref: (1, C_old, TILE_N),
    # [mask_ref: (1, 1, TILE_N)], o_ref: (1, 1, TILE_N)
    if has_mask:
        mask_ref, o_ref = rest
    else:
        (o_ref,) = rest
    x = x_ref[0].astype(jnp.float32)
    t = t_ref[0].astype(jnp.float32)
    loss = _per_pixel_loss(x, t, c_old=c_old, alpha=alpha, approx_div=False)
    if has_mask:
        loss = loss * mask_ref[0]
    o_ref[0] = -loss          # negation fused; partial trailing block writeback is clamped


def _ukd_sum_kernel(x_ref, t_ref, *rest, c_old, alpha, hw, tile_n, nt_per_core,
                    has_mask):
    # inputs : x_ref (1, C_new, TILE_N), t_ref (1, C_old, TILE_N),
    #          [mask_ref (1, 1, TILE_N)]
    # output : o_ref (1, 1, 1)  -- one f32 per (batch, core-split) element
    # scratch: acc_ref (1, TILE_N) f32 lane accumulator
    if has_mask:
        mask_ref, o_ref, acc_ref = rest
    else:
        o_ref, acc_ref = rest

    @pl.when(pl.program_id(2) == 0)
    def _():
        acc_ref[...] = jnp.zeros_like(acc_ref)

    x = x_ref[0].astype(jnp.float32)
    t = t_ref[0].astype(jnp.float32)
    loss = _per_pixel_loss(x, t, c_old=c_old, alpha=alpha, approx_div=True)  # (1, TILE_N)
    if has_mask:
        loss = loss * mask_ref[0]

    if hw % tile_n != 0:
        # Trailing partial block reads undefined tail lanes; discard them
        # (jnp.where also kills any NaN/Inf produced from the garbage lanes).
        lane = jax.lax.broadcasted_iota(jnp.int32, loss.shape, 1)
        blk = pl.program_id(1) * nt_per_core + pl.program_id(2)
        gidx = blk * tile_n + lane
        loss = jnp.where(gidx < hw, loss, jnp.float32(0.0))

    acc_ref[...] += loss      # lane-wise VPU add; no per-step cross-lane reduce

    @pl.when(pl.program_id(2) == pl.num_programs(2) - 1)
    def _():
        o_ref[...] = jnp.sum(acc_ref[...]).reshape(1, 1, 1)


def unbiased_kd_loss(inputs, targets, mask=None, *, alpha=1.0, reduction="mean",
                     max_tile_n=16384, vmem_budget_bytes=8 << 20):
    """JAX/Pallas equivalent of UnbiasedKnowledgeDistillationLoss.forward.

    inputs : (B, C_new, H, W) new-model logits (any float dtype, e.g. bf16)
    targets: (B, C_old, H, W) old-model logits, C_old < C_new
    mask   : optional (B, H, W)
    """
    B, C_new, H, W = inputs.shape
    C_old = targets.shape[1]
    assert C_new > C_old, "inputs must have more channels than targets"
    HW = H * W
    has_mask = mask is not None

    # Stream inputs in their native dtype; math is f32 inside the kernel.
    x = inputs.reshape(B, C_new, HW)
    t = targets.reshape(B, C_old, HW)

    TILE_N = _pick_tile_n(HW, C_new, C_old, inputs.dtype.itemsize, has_mask,
                          budget_bytes=vmem_budget_bytes, max_tile_n=max_tile_n)
    NT = _cdiv(HW, TILE_N)

    cparams = dict(vmem_limit_bytes=32 << 20)

    if reduction not in ("mean", "sum"):
        # reduction='none': per-pixel loss map; mask + negation fused in-kernel.
        kernel = functools.partial(_ukd_map_kernel, c_old=C_old,
                                   alpha=float(alpha), has_mask=has_mask)
        in_specs = [
            pl.BlockSpec((1, C_new, TILE_N), lambda b, n: (b, 0, n)),
            pl.BlockSpec((1, C_old, TILE_N), lambda b, n: (b, 0, n)),
        ]
        operands = [x, t]
        if has_mask:
            in_specs.append(pl.BlockSpec((1, 1, TILE_N), lambda b, n: (b, 0, n)))
            operands.append(mask.reshape(B, 1, HW).astype(jnp.float32))
        loss_map = pl.pallas_call(
            kernel,
            out_shape=jax.ShapeDtypeStruct((B, 1, HW), jnp.float32),
            grid_spec=pltpu.PrefetchScalarGridSpec(
                num_scalar_prefetch=0,
                grid=(B, NT),
                in_specs=in_specs,
                out_specs=pl.BlockSpec((1, 1, TILE_N), lambda b, n: (b, 0, n)),
            ),
            compiler_params=pltpu.CompilerParams(
                dimension_semantics=("parallel", "parallel"), **cparams),
        )(*operands)
        return loss_map.reshape(B, H, W)

    # 'mean'/'sum': fuse mask + spatial reduction; one f32 per (batch, core-split)
    # element is written back.  When B == 1, split the pixel axis 2-way across an
    # extra "parallel" grid axis so both v7x TensorCores stay busy.
    NC = 2 if (B == 1 and NT >= 2 and NT % 2 == 0) else 1
    NTC = NT // NC

    kernel = functools.partial(_ukd_sum_kernel, c_old=C_old, alpha=float(alpha),
                               hw=HW, tile_n=TILE_N, nt_per_core=NTC,
                               has_mask=has_mask)
    in_specs = [
        pl.BlockSpec((1, C_new, TILE_N), lambda b, c, n: (b, 0, c * NTC + n)),
        pl.BlockSpec((1, C_old, TILE_N), lambda b, c, n: (b, 0, c * NTC + n)),
    ]
    operands = [x, t]
    if has_mask:
        in_specs.append(
            pl.BlockSpec((1, 1, TILE_N), lambda b, c, n: (b, 0, c * NTC + n)))
        operands.append(mask.reshape(B, 1, HW).astype(jnp.float32))

    psums = pl.pallas_call(
        kernel,
        out_shape=jax.ShapeDtypeStruct((B * NC, 1, 1), jnp.float32),
        grid_spec=pltpu.PrefetchScalarGridSpec(
            num_scalar_prefetch=0,
            grid=(B, NC, NTC),
            in_specs=in_specs,
            out_specs=pl.BlockSpec((1, 1, 1), lambda b, c, n: (b * NC + c, 0, 0)),
            scratch_shapes=[pltpu.VMEM((1, TILE_N), jnp.float32)],
        ),
        compiler_params=pltpu.CompilerParams(
            dimension_semantics=("parallel", "parallel", "arbitrary"), **cparams),
    )(*operands)

    total = jnp.sum(psums)
    if reduction == "mean":
        return -(total / jnp.float32(B * HW))
    return -total


def _reference(inputs, targets, mask=None, *, alpha=1.0, reduction="mean"):
    # Pure-JAX reference mirroring the PyTorch module.
    new_cl = inputs.shape[1] - targets.shape[1]
    targets = targets * alpha
    den = jax.scipy.special.logsumexp(inputs, axis=1)
    outputs_no_bgk = inputs[:, 1:-new_cl] - den[:, None]
    bkg_idx = jnp.array([0] + list(range(targets.shape[1], inputs.shape[1])))
    outputs_bkg = jax.scipy.special.logsumexp(inputs[:, bkg_idx], axis=1) - den
    labels = jax.nn.softmax(targets, axis=1)
    loss = (labels[:, 0] * outputs_bkg +
            (labels[:, 1:] * outputs_no_bgk).sum(axis=1)) / targets.shape[1]
    if mask is not None:
        loss = loss * mask.astype(jnp.float32)
    if reduction == "mean":
        return -jnp.mean(loss)
    if reduction == "sum":
        return -jnp.sum(loss)
    return -loss


if __name__ == "__main__":
    key = jax.random.PRNGKey(0)
    keys = jax.random.split(key, 8)

    # Primary shape: batch=2, C_new=8 (C_old=5 -> 3 new classes), spatial 16x16.
    B, C_new, C_old, H, W = 2, 8, 5, 16, 16
    inputs = jax.random.normal(keys[0], (B, C_new, H, W), dtype=jnp.float32)
    targets = jax.random.normal(keys[1], (B, C_old, H, W), dtype=jnp.float32)
    mask = (jax.random.uniform(keys[2], (B, H, W)) > 0.5).astype(jnp.float32)

    # 1) mean, no mask (fused-reduction kernel; approx reciprocal -> looser tol).
    out = jax.block_until_ready(unbiased_kd_loss(inputs, targets))
    ref = _reference(inputs, targets)
    assert jnp.allclose(out, ref, rtol=5e-3, atol=5e-3), (out, ref)

    # 2) mean, with mask and alpha != 1 (fused mask path).
    out = jax.block_until_ready(
        unbiased_kd_loss(inputs, targets, mask=mask, alpha=0.5))
    ref = _reference(inputs, targets, mask=mask, alpha=0.5)
    assert jnp.allclose(out, ref, rtol=5e-3, atol=5e-3), (out, ref)

    # 3) reduction='none' (per-pixel map kernel, exact divide), with/without mask.
    out = jax.block_until_ready(unbiased_kd_loss(inputs, targets, reduction="none"))
    ref = _reference(inputs, targets, reduction="none")
    assert jnp.allclose(out, ref, rtol=1e-5, atol=1e-5)
    out = jax.block_until_ready(
        unbiased_kd_loss(inputs, targets, mask=mask, reduction="none"))
    ref = _reference(inputs, targets, mask=mask, reduction="none")
    assert jnp.allclose(out, ref, rtol=1e-5, atol=1e-5)

    # 4) sum reduction, HW not a multiple of 128 (partial trailing block + tail mask).
    B2, Cn2, Co2, H2, W2 = 2, 7, 4, 10, 10
    x2 = jax.random.normal(keys[3], (B2, Cn2, H2, W2), dtype=jnp.float32)
    t2 = jax.random.normal(keys[4], (B2, Co2, H2, W2), dtype=jnp.float32)
    out = jax.block_until_ready(unbiased_kd_loss(x2, t2, reduction="sum"))
    ref = _reference(x2, t2, reduction="sum")
    assert jnp.allclose(out, ref, rtol=5e-3, atol=5e-3), (out, ref)

    # 5) B=1: exercises the 2-way core split, multi-step lane accumulation,
    #    partial trailing block and fused mask (small max_tile_n forces NT=4).
    B3, Cn3, Co3, H3, W3 = 1, 8, 5, 30, 30
    x3 = jax.random.normal(keys[5], (B3, Cn3, H3, W3), dtype=jnp.float32)
    t3 = jax.random.normal(keys[6], (B3, Co3, H3, W3), dtype=jnp.float32)
    m3 = (jax.random.uniform(keys[7], (B3, H3, W3)) > 0.3).astype(jnp.float32)
    out = jax.block_until_ready(
        unbiased_kd_loss(x3, t3, mask=m3, reduction="sum", max_tile_n=256))
    ref = _reference(x3, t3, mask=m3, reduction="sum")
    assert jnp.allclose(out, ref, rtol=5e-3, atol=5e-3), (out, ref)

    # 6) 'none' with HW % 128 != 0 (partial output block writeback).
    out = jax.block_until_ready(
        unbiased_kd_loss(x3, t3, mask=m3, reduction="none", max_tile_n=256))
    ref = _reference(x3, t3, mask=m3, reduction="none")
    assert jnp.allclose(out, ref, rtol=1e-5, atol=1e-5)

    print("KERNEL_OK")
</pallas_src>

<mosaic_0001>
module attributes {stable_mosaic.version = 11 : i64} {
  func.func @_ukd_sum_kernel(%arg0: i32, %arg1: i32, %arg2: i32, %arg3: memref<1x8x256xf32, #tpu.memory_space<vmem>>, %arg4: memref<1x5x256xf32, #tpu.memory_space<vmem>>, %arg5: memref<1x1x1xf32, #tpu.memory_space<vmem>>, %arg6: memref<1x256xf32, #tpu.memory_space<vmem>>) attributes {dimension_semantics = [#tpu.dimension_semantics<parallel>, #tpu.dimension_semantics<parallel>, #tpu.dimension_semantics<arbitrary>], iteration_bounds = array<i64: 2, 1, 1>, scalar_prefetch = 0 : i64, scratch_operands = 1 : i64, tpu.core_type = #tpu.core_type<tc>, window_params = [{transform_indices = @transform_0, window_bounds = array<i64: 1, 8, 256>}, {transform_indices = @transform_1, window_bounds = array<i64: 1, 5, 256>}, {transform_indices = @transform_2, window_bounds = array<i64: 1, 1, 1>}]} {
    %c0_i32 = arith.constant 0 : i32
    %0 = arith.cmpi eq, %arg2, %c0_i32 : i32
    %1 = arith.extui %0 : i1 to i32
    %c0_i32_0 = arith.constant 0 : i32
    %2 = arith.cmpi ne, %1, %c0_i32_0 : i32
    scf.if %2 {
      %cst_19 = arith.constant 0.000000e+00 : f32
      %55 = vector.broadcast %cst_19 : f32 to vector<1x256xf32>
      %c0_20 = arith.constant 0 : index
      %c0_21 = arith.constant 0 : index
      %56 = vector.load %arg6[%c0_20, %c0_21] : memref<1x256xf32, #tpu.memory_space<vmem>>, vector<1x256xf32>
      tpu.vector_store %arg6[%c0_20, %c0_21], %55 {strides = array<i32>} : memref<1x256xf32, #tpu.memory_space<vmem>>, vector<1x256xf32>,
    } else {
    }
    %c0 = arith.constant 0 : index
    %c0_1 = arith.constant 0 : index
    %c0_2 = arith.constant 0 : index
    %3 = vector.load %arg3[%c0, %c0_1, %c0_2] : memref<1x8x256xf32, #tpu.memory_space<vmem>>, vector<1x8x256xf32>
    %4 = vector.shape_cast %3 : vector<1x8x256xf32> to vector<8x256xf32>
    %c0_3 = arith.constant 0 : index
    %c0_4 = arith.constant 0 : index
    %c0_5 = arith.constant 0 : index
    %5 = vector.load %arg4[%c0_3, %c0_4, %c0_5] : memref<1x5x256xf32, #tpu.memory_space<vmem>>, vector<1x5x256xf32>
    %6 = vector.shape_cast %5 : vector<1x5x256xf32> to vector<5x256xf32>
    %cst = arith.constant dense<0xFF800000> : vector<256xf32>
    %7 = vector.multi_reduction <maximumf>, %4, %cst [0] : vector<8x256xf32> to vector<256xf32>
    %8 = vector.shape_cast %7 : vector<256xf32> to vector<1x256xf32>
    %9 = vector.broadcast %8 : vector<1x256xf32> to vector<8x256xf32>
    %10 = arith.subf %4, %9 : vector<8x256xf32>
    %11 = math.exp %10 : vector<8x256xf32>
    %cst_6 = arith.constant dense<0.000000e+00> : vector<256xf32>
    %12 = vector.multi_reduction <add>, %11, %cst_6 [0] : vector<8x256xf32> to vector<256xf32>
    %13 = vector.shape_cast %12 : vector<256xf32> to vector<1x256xf32>
    %14 = math.log %13 : vector<1x256xf32>
    %15 = arith.addf %8, %14 : vector<1x256xf32>
    %16 = vector.extract_strided_slice %11 {offsets = [0, 0], sizes = [5, 256], strides = [1, 1]} : vector<8x256xf32> to vector<5x256xf32>
    %cst_7 = arith.constant dense<0.000000e+00> : vector<256xf32>
    %17 = vector.multi_reduction <add>, %16, %cst_7 [0] : vector<5x256xf32> to vector<256xf32>
    %18 = vector.shape_cast %17 : vector<256xf32> to vector<1x256xf32>
    %19 = vector.extract_strided_slice %11 {offsets = [0, 0], sizes = [1, 256], strides = [1, 1]} : vector<8x256xf32> to vector<1x256xf32>
    %20 = arith.subf %18, %19 : vector<1x256xf32>
    %21 = arith.subf %13, %20 : vector<1x256xf32>
    %cst_8 = arith.constant 9.99999991E-38 : f32
    %22 = vector.broadcast %cst_8 : f32 to vector<1x256xf32>
    %23 = arith.maximumf %21, %22 : vector<1x256xf32>
    %24 = math.log %23 : vector<1x256xf32>
    %25 = arith.subf %24, %14 : vector<1x256xf32>
    %cst_9 = arith.constant dense<0xFF800000> : vector<256xf32>
    %26 = vector.multi_reduction <maximumf>, %6, %cst_9 [0] : vector<5x256xf32> to vector<256xf32>
    %27 = vector.shape_cast %26 : vector<256xf32> to vector<1x256xf32>
    %28 = vector.broadcast %27 : vector<1x256xf32> to vector<5x256xf32>
    %29 = arith.subf %6, %28 : vector<5x256xf32>
    %30 = math.exp %29 : vector<5x256xf32>
    %cst_10 = arith.constant dense<0.000000e+00> : vector<256xf32>
    %31 = vector.multi_reduction <add>, %30, %cst_10 [0] : vector<5x256xf32> to vector<256xf32>
    %32 = vector.shape_cast %31 : vector<256xf32> to vector<1x256xf32>
    %33 = vector.extract_strided_slice %30 {offsets = [0, 0], sizes = [1, 256], strides = [1, 1]} : vector<5x256xf32> to vector<1x256xf32>
    %34 = vector.extract_strided_slice %4 {offsets = [0, 0], sizes = [5, 256], strides = [1, 1]} : vector<8x256xf32> to vector<5x256xf32>
    %35 = arith.mulf %30, %34 : vector<5x256xf32>
    %cst_11 = arith.constant dense<0.000000e+00> : vector<256xf32>
    %36 = vector.multi_reduction <add>, %35, %cst_11 [0] : vector<5x256xf32> to vector<256xf32>
    %37 = vector.shape_cast %36 : vector<256xf32> to vector<1x256xf32>
    %38 = vector.extract_strided_slice %35 {offsets = [0, 0], sizes = [1, 256], strides = [1, 1]} : vector<5x256xf32> to vector<1x256xf32>
    %39 = arith.subf %37, %38 : vector<1x256xf32>
    %40 = arith.mulf %33, %25 : vector<1x256xf32>
    %41 = arith.addf %40, %39 : vector<1x256xf32>
    %42 = arith.subf %32, %33 : vector<1x256xf32>
    %43 = arith.mulf %42, %15 : vector<1x256xf32>
    %44 = arith.subf %41, %43 : vector<1x256xf32>
    %cst_12 = arith.constant 5.000000e+00 : f32
    %45 = vector.broadcast %cst_12 : f32 to vector<1x256xf32>
    %46 = arith.mulf %32, %45 : vector<1x256xf32>
    %47 = tpu.reciprocal %46 {approx = true} : vector<1x256xf32> -> vector<1x256xf32>
    %48 = arith.mulf %44, %47 : vector<1x256xf32>
    %c0_13 = arith.constant 0 : index
    %c0_14 = arith.constant 0 : index
    %49 = vector.load %arg6[%c0_13, %c0_14] : memref<1x256xf32, #tpu.memory_space<vmem>>, vector<1x256xf32>
    %50 = arith.addf %49, %48 : vector<1x256xf32>
    %c0_15 = arith.constant 0 : index
    %c0_16 = arith.constant 0 : index
    %51 = vector.load %arg6[%c0_15, %c0_16] : memref<1x256xf32, #tpu.memory_space<vmem>>, vector<1x256xf32>
    tpu.vector_store %arg6[%c0_15, %c0_16], %50 {strides = array<i32>} : memref<1x256xf32, #tpu.memory_space<vmem>>, vector<1x256xf32>,
    %c0_i32_17 = arith.constant 0 : i32
    %52 = arith.cmpi eq, %arg2, %c0_i32_17 : i32
    %53 = arith.extui %52 : i1 to i32
    %c0_i32_18 = arith.constant 0 : i32
    %54 = arith.cmpi ne, %53, %c0_i32_18 : i32
    scf.if %54 {
      %c0_19 = arith.constant 0 : index
      %c0_20 = arith.constant 0 : index
      %55 = vector.load %arg6[%c0_19, %c0_20] : memref<1x256xf32, #tpu.memory_space<vmem>>, vector<1x256xf32>
      %56 = vector.shape_cast %55 : vector<1x256xf32> to vector<1x1x256xf32>
      %cst_21 = arith.constant dense<0.000000e+00> : vector<1xf32>
      %57 = vector.multi_reduction <add>, %56, %cst_21 [1, 2] : vector<1x1x256xf32> to vector<1xf32>
      %58 = vector.shape_cast %57 : vector<1xf32> to vector<1x1x1xf32>
      %59 = vector.extract %58[0, 0, 0] : f32 from vector<1x1x1xf32>
      %60 = vector.broadcast %59 : f32 to vector<1x1x1xf32>
      %c0_22 = arith.constant 0 : index
      %c0_23 = arith.constant 0 : index
      %c0_24 = arith.constant 0 : index
      %61 = vector.load %arg5[%c0_22, %c0_23, %c0_24] : memref<1x1x1xf32, #tpu.memory_space<vmem>>, vector<1x1x1xf32>
      tpu.vector_store %arg5[%c0_22, %c0_23, %c0_24], %60 {strides = array<i32>} : memref<1x1x1xf32, #tpu.memory_space<vmem>>, vector<1x1x1xf32>,
    } else {
    }
    return
  }
  func.func @transform_0(%arg0: i32, %arg1: i32, %arg2: i32) -> (i32, i32, i32) {
    %c1_i32 = arith.constant 1 : i32
    %0 = arith.muli %arg1, %c1_i32 : i32
    %1 = arith.addi %0, %arg2 : i32
    %c0_i32 = arith.constant 0 : i32
    %c0_i32_0 = arith.constant 0 : i32
    return %arg0, %c0_i32, %1 : i32, i32, i32
  }
  func.func @transform_1(%arg0: i32, %arg1: i32, %arg2: i32) -> (i32, i32, i32) {
    %c1_i32 = arith.constant 1 : i32
    %0 = arith.muli %arg1, %c1_i32 : i32
    %1 = arith.addi %0, %arg2 : i32
    %c0_i32 = arith.constant 0 : i32
    %c0_i32_0 = arith.constant 0 : i32
    return %arg0, %c0_i32, %1 : i32, i32, i32
  }
  func.func @transform_2(%arg0: i32, %arg1: i32, %arg2: i32) -> (i32, i32, i32) {
    %c1_i32 = arith.constant 1 : i32
    %0 = arith.muli %arg0, %c1_i32 : i32
    %1 = arith.addi %0, %arg1 : i32
    %c0_i32 = arith.constant 0 : i32
    %c0_i32_0 = arith.constant 0 : i32
    %c0_i32_1 = arith.constant 0 : i32
    return %1, %c0_i32, %c0_i32_0 : i32, i32, i32
  }
}

</mosaic_0001>

<bundles_post_ra>
// kernel: tpu_custom_call.1
= control target key start
LH: loop header
LB: loop body
LE: loop exit
PB: predicated region body
PF: predicated region fallthrough
CT: control target
= control target key end

     0   :  { %s618_s9 = smov 0   ;;  %s620_s10 = smov 0   ;;  %s704_s0 = inlined_call_operand.vmem [shape: f32[2,8,256], index: 0, kind: input, shape index: {}]   ;;  %s705_s1 = inlined_call_operand.vmem [shape: f32[2,5,256], index: 1, kind: input, shape index: {}]   ;;  %s706_s2 = inlined_call_operand.vmem [shape: f32[2,1,1], index: 2, kind: output, shape index: {}]  }
   0x1   :  { %s622_s11 = smov 0  }
   0x2 LB: > { %s31_s12 = sadd.s32 1, %s595_s10  ;;  %p520_p0 = scmp.ge.s32.totalorder %s599_s11, 1  ;;  %s599_s11 = sphi %s622_s11, %s12_s11   ;;  %s595_s10 = sphi %s620_s10, %s710_s10   ;;  %s591_s9 = sphi %s618_s9, %s709_s9  }
   0x3   : > { %p33_p1 = scmp.ge.s32.totalorder %s31_s12, 2  ;;  %p165_p2 = scmp.lt.s32.totalorder %s599_s11, 3 }
   0x5   : > { %s712_s12 = smov (%p33_p1, %s31_s12), 0  ;;  %p166_p3 = pnand %p520_p0, %p165_p2 }
   0x6   : > { %p203_p4 = scmp.lt.s32.totalorder (!%p166_p3), %s591_s9, 1  ;;  %v234_v0 = vlaneseq (!%p166_p3)  ;;  %v601_v2 = vmov (!%p166_p3), 0.0   ;;  %vm279_vm1 = vcmask (!%p166_p3), 1044480   ;;  %vm414_vm2 = vcmask (!%p166_p3), 1040384  }
   0x7   : > { %169 = sbr.rel (%p166_p3) target bundleno = 315 (0x13b), region = 28  ;;  %vm428_vm3 = vcmask (!%p166_p3), 0  }
   0x8   : > { %vm639_vm0 = vcmp.lt.s32.totalorder (!%p166_p3), %v234_v0, 256 }
   0x9   : > { %238 = vst.msk [vmem:[#allocation2] sm:$0x3] (!%p166_p3), %vm639_vm0, %v601_v2 }
   0xe   : > { %s714_s9 = smov (!%p203_p4, %s591_s9), 1 }
   0xf   : > { %s527_s13 = sshll.u32 %s714_s9, 4  ;;  %s228_s22 = scalar_lea.vmem %s706_s2, %s714_s9 }
  0x10   : > { %s210_s16 = scalar_lea.vmem %s704_s0, %s527_s13  ;;  %s222_s19 = scalar_lea.vmem %s705_s1, %s527_s13 }
  0x11   : > { %v239_v3 = vld [vmem:[%s210_s16] sm:$0xff]  ;;  %v240_v4 = vld [vmem:[%s210_s16 + $0x8] sm:$0xff] }
  0x12   : > { %v241_v5 = vld [vmem:[%s222_s19] sm:$0x1f]  ;;  %v242_v6 = vld [vmem:[%s222_s19 + $0x8] sm:$0x1f]  ;;  %v243_v7 = vrot.slane %v239_v3, 4  ;;  %v249_v8 = vrot.slane %v240_v4, 4 }
  0x13   : > { %v306_v9 = vsel %vm279_vm1, %v241_v5, -inf  ;;  %v313_v11 = vsel %vm279_vm1, %v242_v6, -inf }
  0x14   : > { %v307_v10 = vrot.slane %v306_v9, 4  ;;  %v244_v12 = vmax.f32 %v239_v3, %v243_v7  ;;  %v250_v13 = vmax.f32 %v240_v4, %v249_v8  ;;  %v314_v14 = vrot.slane %v313_v11, 4 }
  0x16   : > { %v308_v15 = vmax.f32 %v306_v9, %v307_v10  ;;  %v245_v16 = vrot.slane %v244_v12, 2  ;;  %v251_v17 = vrot.slane %v250_v13, 2  ;;  %v315_v18 = vmax.f32 %v313_v11, %v314_v14 }
  0x18   : > { %v309_v19 = vrot.slane %v308_v15, 2  ;;  %v246_v20 = vmax.f32 %v244_v12, %v245_v16  ;;  %v252_v21 = vmax.f32 %v250_v13, %v251_v17  ;;  %v316_v22 = vrot.slane %v315_v18, 2 }
  0x1a   : > { %v310_v23 = vmax.f32 %v308_v15, %v309_v19  ;;  %v247_v24 = vrot.slane %v246_v20, 1  ;;  %v253_v25 = vrot.slane %v252_v21, 1  ;;  %v317_v26 = vmax.f32 %v315_v18, %v316_v22 }
  0x1c   : > { %v311_v27 = vrot.slane %v310_v23, 1  ;;  %v654_v28 = vmax.f32 %v246_v20, %v247_v24  ;;  %v656_v29 = vmax.f32 %v252_v21, %v253_v25  ;;  %v318_v30 = vrot.slane %v317_v26, 1 }
  0x1e   : > { %v312_v31 = vmax.f32 %v310_v23, %v311_v27  ;;  %v255_v32 = vsub.f32 %v239_v3, %v654_v28  ;;  %v256_v33 = vsub.f32 %v240_v4, %v656_v29  ;;  %v319_v34 = vmax.f32 %v317_v26, %v318_v30 }
  0x20   : > { %v320_v35 = vsub.f32 %v241_v5, %v312_v31  ;;  %v257_v36 = vmul.f32 1.442695, %v255_v32  ;;  %v259_v37 = vmul.f32 1.442695, %v256_v33  ;;  %v321_v38 = vsub.f32 %v242_v6, %v319_v34 }
  0x22   : > { %v322_v39 = vmul.f32 1.442695, %v320_v35  ;;  %557 = vpow2.f32 %v257_v36  ;;  %v324_v40 = vmul.f32 1.442695, %v321_v38 }
  0x23   : > { %559 = vpow2.f32 %v259_v37 }
  0x24   : > { %561 = vpow2.f32 %v322_v39 }
  0x25   : > { %563 = vpow2.f32 %v324_v40 }
  0x2c   : > { %v558_v41 = vpop.eup %557 }
  0x2d   : > { %v560_v42 = vpop.eup %559  ;;  %v261_v43 = vrot.slane %v558_v41, 4  ;;  %v280_v44 = vsel %vm279_vm1, %v558_v41, 0.0 }
  0x2e   : > { %v661_v45 = vpop.eup %561  ;;  %v267_v46 = vrot.slane %v560_v42, 4  ;;  %v281_v47 = vrot.slane %v280_v44, 4  ;;  %v287_v48 = vsel %vm279_vm1, %v560_v42, 0.0 }
  0x2f   : > { %v664_v49 = vpop.eup %563  ;;  %v262_v50 = vadd.f32 %v558_v41, %v261_v43  ;;  %v288_v51 = vrot.slane %v287_v48, 4  ;;  %v326_v52 = vsel %vm279_vm1, %v661_v45, 0.0  ;;  %v669_v53 = vmul.f32 %v661_v45, %v239_v3 }
  0x30   : > { %v268_v54 = vadd.f32 %v560_v42, %v267_v46  ;;  %v282_v55 = vadd.f32 %v281_v47, %v280_v44  ;;  %v327_v56 = vrot.slane %v326_v52, 4  ;;  %v333_v57 = vsel %vm279_vm1, %v664_v49, 0.0 }
  0x31   : > { %v263_v58 = vrot.slane %v262_v50, 2  ;;  %v289_v59 = vadd.f32 %v288_v51, %v287_v48  ;;  %v334_v60 = vrot.slane %v333_v57, 4  ;;  %v674_v61 = vmul.f32 %v664_v49, %v240_v4 }
  0x32   : > { %v269_v62 = vrot.slane %v268_v54, 2  ;;  %v283_v63 = vrot.slane %v282_v55, 2  ;;  %v328_v2 = vadd.f32 %v327_v56, %v326_v52  ;;  %v342_v5 = vsel %vm279_vm1, %v669_v53, 0.0 }
  0x33   : > { %v264_v3 = vadd.f32 %v263_v58, %v262_v50  ;;  %v290_v6 = vrot.slane %v289_v59, 2  ;;  %v335_v7 = vadd.f32 %v334_v60, %v333_v57  ;;  %v349_v11 = vsel %vm279_vm1, %v674_v61, 0.0 }
  0x34   : > { %v270_v8 = vadd.f32 %v269_v62, %v268_v54  ;;  %v284_v9 = vadd.f32 %v283_v63, %v282_v55  ;;  %v329_v10 = vrot.slane %v328_v2, 2  ;;  %v343_v4 = vrot.slane %v342_v5, 4 }
  0x35   : > { %v265_v12 = vrot.slane %v264_v3, 1  ;;  %v291_v13 = vadd.f32 %v290_v6, %v289_v59  ;;  %v336_v14 = vrot.slane %v335_v7, 2  ;;  %v350_v17 = vrot.slane %v349_v11, 4 }
  0x36   : > { %v271_v15 = vrot.slane %v270_v8, 1  ;;  %v285_v16 = vrot.slane %v284_v9, 1  ;;  %v330_v21 = vadd.f32 %v329_v10, %v328_v2  ;;  %v344_v25 = vadd.f32 %v343_v4, %v342_v5 }
  0x37   : > { %v292_v18 = vrot.slane %v291_v13, 1  ;;  %v266_v19 = vadd.f32 %v265_v12, %v264_v3  ;;  %v337_v24 = vadd.f32 %v336_v14, %v335_v7  ;;  %v351_v27 = vadd.f32 %v350_v17, %v349_v11 }
  0x38   : > { %v286_v20 = vadd.f32 %v285_v16, %v284_v9  ;;  %v272_v22 = vadd.f32 %v271_v15, %v270_v8  ;;  %v331_v32 = vrot.slane %v330_v21, 1  ;;  %v345_v35 = vrot.slane %v344_v25, 2 }
  0x39   : > { %v293_v23 = vadd.f32 %v292_v18, %v291_v13  ;;  %565 = vlog2.f32 %v266_v19  ;;  %v338_v34 = vrot.slane %v337_v24, 1  ;;  %v352_v37 = vrot.slane %v351_v27, 2 }
  0x3a   : > { %v294_v26 = vsub.f32 %v286_v20, %v558_v41  ;;  %567 = vlog2.f32 %v272_v22  ;;  %v332_v39 = vadd.f32 %v331_v32, %v330_v21  ;;  %v346_v43 = vadd.f32 %v345_v35, %v344_v25 }
  0x3b   : > { %v295_v30 = vsub.f32 %v293_v23, %v560_v42  ;;  %v339_v40 = vadd.f32 %v338_v34, %v337_v24  ;;  %v353_v44 = vadd.f32 %v352_v37, %v351_v27  ;;  %v602_v8 = vmov 1966171168  }
  0x3c   : > { %v296_v31 = vsub.f32 %v266_v19, %v294_v26  ;;  %v368_v46 = vmul.f32 5.0, %v332_v39  ;;  %v347_v41 = vrot.slane %v346_v43, 1  ;;  %v362_v60 = vsub.f32 %v332_v39, %v661_v45 }
  0x3d   : > { %v297_v33 = vsub.f32 %v272_v22, %v295_v30  ;;  %v369_v47 = vmul.f32 5.0, %v339_v40  ;;  %v354_v48 = vrot.slane %v353_v44, 1  ;;  %v363_v2 = vsub.f32 %v339_v40, %v664_v49  ;;  %v374_v22 = vld [vmem:[#allocation2] sm:$0x3] }
  0x3e   : > { %v298_v36 = vmax.f32 %v296_v31, 1e-37  ;;  %v348_v52 = vadd.f32 %v347_v41, %v346_v43  ;;  %v379_v9 = vunpack.c.l.s4 %v602_v8  ;;  %v382_v15 = vshrl.u32 %v234_v0, 7 }
  0x3f   : > { %v299_v38 = vmax.f32 %v297_v33, 1e-37  ;;  %v355_v56 = vadd.f32 %v354_v48, %v353_v44 }
  0x40   : > { %569 = vlog2.f32 %v298_v36  ;;  %v356_v3 = vsub.f32 %v348_v52, %v669_v53  ;;  %v380_v4 = vunpack.c.0.s8 %v379_v9  ;;  %v410_v24 = vsub.s32 1, %v382_v15 }
  0x41   : > { %571 = vlog2.f32 %v299_v38  ;;  %v357_v7 = vsub.f32 %v355_v56, %v674_v61 }
  0x42   : > { %573 = vrcp.f32 %v368_v46  ;;  %v383_v61 = vsub.s32 %v380_v4, %v382_v15 }
  0x43   : > { %v566_v42 = vpop.eup %565  ;;  %575 = vrcp.f32 %v369_v47 }
  0x44   : > { %v568_v50 = vpop.eup %567  ;;  %v274_v51 = vmul.f32 0.6931472, %v566_v42 }
  0x45   : > { %v276_v55 = vmul.f32 0.6931472, %v568_v50 }
  0x46   : > { %v277_v58 = vadd.f32 %v274_v51, %v654_v28 }
  0x47   : > { %v278_v62 = vadd.f32 %v276_v55, %v656_v29 }
  0x48   : > { %v364_v11 = vmul.f32 %v362_v60, %v277_v58 }
  0x49   : > { %v365_v12 = vmul.f32 %v363_v2, %v278_v62 }
  0x4a   : > { %v570_v54 = vpop.eup %569 }
  0x4b   : > { %v572_v57 = vpop.eup %571  ;;  %v301_v59 = vmul.f32 0.6931472, %v570_v54 }
  0x4c   : > { %v303_v63 = vmul.f32 0.6931472, %v572_v57  ;;  %v574_v14 = vpop.eup %573 }
  0x4d   : > { %v304_v5 = vsub.f32 %v301_v59, %v274_v51  ;;  %v576_v16 = vpop.eup %575 }
  0x4e   : > { %v305_v6 = vsub.f32 %v303_v63, %v276_v55 }
  0x4f   : > { %v358_v10 = vmul.f32 %v661_v45, %v304_v5 }
  0x50   : > { %v359_v28 = vmul.f32 %v664_v49, %v305_v6  ;;  %v406_v49 = vsub.s32 0, %v382_v15 }
  0x51   : > { %v360_v13 = vadd.f32 %v358_v10, %v356_v3 }
  0x52   : > { %v361_v29 = vadd.f32 %v359_v28, %v357_v7 }
  0x53   : > { %v366_v17 = vsub.f32 %v360_v13, %v364_v11 }
  0x54   : > { %v367_v53 = vsub.f32 %v361_v29, %v365_v12 }
  0x55   : > { %v372_v18 = vmul.f32 %v574_v14, %v366_v17 }
  0x56   : > { %v373_v19 = vmul.f32 %v576_v16, %v367_v53 }
  0x58   : > { %v377_v20 = vcombine.low %v372_v18, %v373_v19 }
  0x5a   : > { %v384_v21 = vrot.slane %v377_v20, %v383_v61 }
  0x5c   : > { %v391_v45 = vrot.slane %v384_v21, %v383_v61 }
  0x5e   : > { %v393_v23 = vadd.f32 %v391_v45, %v374_v22 }
  0x60   : > { %398 = vst.msk [vmem:[#allocation2] sm:$0x3] %vm639_vm0, %v393_v23 }
  0x67   : > { %v402_v25 = vld [vmem:[#allocation2] sm:$0x3] }
  0x68   : > { %v407_v0 = vrot.slane %v402_v25, %v406_v49  ;;  %v411_v26 = vrot.slane %v402_v25, %v410_v24 }
  0x6a   : > { %v415_v27 = vsel %vm414_vm2, %v407_v0, 0.0  ;;  %v416_v30 = vsel %vm414_vm2, %v411_v26, 0.0 }
  0x6b   : > { %v417_v31 = vadd.f32 %v416_v30, %v415_v27 }
  0x6d   : > { %418 = vadd.xlane.f32.xlu0 %v417_v31 }
  0xfa   : > { %v419_v32 = vpop.xlane.xlu0 %418 }
  0xfb   : > { %v420_v33 = vrot.slane %v419_v32, 4 }
  0xfd   : > { %v421_v34 = vadd.f32 %v420_v33, %v419_v32 }
  0xff   : > { %v422_v35 = vrot.slane %v421_v34, 2 }
 0x101   : > { %v423_v36 = vadd.f32 %v422_v35, %v421_v34 }
 0x103   : > { %v424_v37 = vrot.slane %v423_v36, 1 }
 0x105   : > { %v425_v38 = vadd.f32 %v424_v37, %v423_v36 }
 0x107   : > { %529 = vpush %v425_v38 }
 0x138   : > { %s530_s23 = spop %529 }
 0x139   : > { %v427_v1 = vstv %s530_s23 }
 0x13a   : > { %429 = vst.msk [vmem:[%s228_s22] sm:$0x1] %vm428_vm3, %v427_v1 }
 0x13b PF: > { %s12_s11 = sadd.s32 1, %s599_s11   ;;  %s709_s9 = smov %s595_s10 }
 0x13c   : > { %p9_p5 = scmp.ge.s32.totalorder %s12_s11, 4   ;;  %s710_s10 = smov %s712_s12 }
 0x13e   :  { %11 = sbr.rel (!%p9_p5) target bundleno = 2 (0x2), region = 69 }

</bundles_post_ra>
